<compile_context>
chip_gen: v5e
topology: v5e:2x2
jax: 0.10.0
libtpu: 0.0.40
codegen_flags: <defaults>
</compile_context>

<pallas_src>
import numpy as np
import jax
import jax.numpy as jnp
from jax.experimental import pallas as pl
from jax.experimental.pallas import tpu as pltpu

# ---- model hyper-parameters (from LinearGNNLayer.__init__) -------------------
IN_DIM = 9          # in_dim_node
D0 = 50             # proj  : 9  -> 50
D1 = 50             # proj1 : 50 -> 50
D2 = 1              # proj2 : 50 -> 1
NEG_SLOPE = 0.01    # nn.LeakyReLU() default negative_slope

PARAM_ORDER = ("w0", "b0", "w1", "b1", "w2", "b2")


def _leaky_relu(x):
    return jnp.where(x > 0.0, x, NEG_SLOPE * x)


# ----------------------------- Pallas kernel ----------------------------------
def linear_gnn_kernel(x_ref, inv_n_ref,
                      w0_ref, b0_ref, w1_ref, b1_ref, w2_ref, b2_ref,
                      out_ref):
    f32 = jnp.float32
    x = x_ref[...]                                     # [G, N*IN_DIM]

    # dgl.mean_nodes + proj, fused on the MXU:
    #   (sum_i h[:, i, :]) @ w0 == h_flat @ tile(w0, (N, 1)), scaled by 1/n afterwards.
    y = jnp.dot(x, w0_ref[...], preferred_element_type=f32)
    y = y * inv_n_ref[...] + b0_ref[...]               # [G, 50]
    y = _leaky_relu(y)

    y = jnp.dot(y, w1_ref[...], preferred_element_type=f32) + b1_ref[...]
    y = _leaky_relu(y)

    y = jnp.dot(y, w2_ref[...], preferred_element_type=f32) + b2_ref[...]
    out_ref[...] = _leaky_relu(y)                      # [G, 1]


# ------------------------------- wrapper ---------------------------------------
def linear_gnn_layer(h_nodes, n_nodes, params, *, graphs_per_step=1024):
    B, N, F = h_nodes.shape
    assert F == IN_DIM
    K = N * F                                          # flattened feature width (144)

    # Flatten node features: contiguous row-major reshape, no data movement.
    h_flat = h_nodes.reshape(B, K)
    inv_n = (1.0 / n_nodes).astype(jnp.float32)        # [B, 1] exact reciprocal

    # Node-tiled first-layer weight so the node sum rides the MXU contraction.
    w0_big = jnp.tile(params["w0"], (N, 1))            # [K, D0], ~29 KiB
    weights = [w0_big, params["b0"], params["w1"], params["b1"],
               params["w2"], params["b2"]]

    # Graph-block size: the whole batch when it fits a single step, otherwise a
    # multiple of 8 sublanes. The ragged tail (B % G != 0) is handled by Pallas'
    # masked partial last block instead of a host-side jnp.pad copy.
    if B <= graphs_per_step:
        G = B
    else:
        G = max(8, (int(graphs_per_step) // 8) * 8)
    n_steps = pl.cdiv(B, G)

    def full_spec(w):
        nd = w.ndim
        return pl.BlockSpec(w.shape, lambda b, _nd=nd: (0,) * _nd)

    in_specs = ([pl.BlockSpec((G, K), lambda b: (b, 0)),
                 pl.BlockSpec((G, 1), lambda b: (b, 0))]
                + [full_spec(w) for w in weights])

    flops = 2 * B * (K * D0 + D0 * D1 + D1 * D2)
    bytes_accessed = 4 * (B * (K + 1 + 1)
                          + K * D0 + D0 + D0 * D1 + D1 + D1 * D2 + D2)

    return pl.pallas_call(
        linear_gnn_kernel,
        out_shape=jax.ShapeDtypeStruct((B, 1), jnp.float32),
        grid=(n_steps,),
        in_specs=in_specs,
        out_specs=pl.BlockSpec((G, 1), lambda b: (b, 0)),
        compiler_params=pltpu.CompilerParams(
            dimension_semantics=("parallel",)),        # v7x: split groups over 2 TCs
        cost_estimate=pl.CostEstimate(flops=flops, transcendentals=0,
                                      bytes_accessed=bytes_accessed),
    )(h_flat, inv_n, *weights)


# --------------------------- parameter init ------------------------------------
def init_params(key):
    ks = jax.random.split(key, 3)

    def lin(k, fan_in, fan_out):
        # PyTorch nn.Linear default init: U(-1/sqrt(fan_in), 1/sqrt(fan_in))
        bound = 1.0 / float(np.sqrt(fan_in))
        kw, kb = jax.random.split(k)
        w = jax.random.uniform(kw, (fan_in, fan_out), jnp.float32, -bound, bound)
        b = jax.random.uniform(kb, (1, fan_out), jnp.float32, -bound, bound)
        return w, b

    p = {}
    p["w0"], p["b0"] = lin(ks[0], IN_DIM, D0)
    p["w1"], p["b1"] = lin(ks[1], D0, D1)
    p["w2"], p["b2"] = lin(ks[2], D1, D2)
    return p


# ------------------------ pure-JAX reference (check) ----------------------------
def reference_forward(h_nodes, n_nodes, p):
    hg = h_nodes.sum(axis=1) / n_nodes                  # dgl.mean_nodes
    y = _leaky_relu(hg @ p["w0"] + p["b0"])
    y = _leaky_relu(y @ p["w1"] + p["b1"])
    y = _leaky_relu(y @ p["w2"] + p["b2"])
    return y


# --------------------------------- main -----------------------------------------
if __name__ == "__main__":
    B, N = 24, 16
    key = jax.random.PRNGKey(0)
    k_feat, k_cnt, k_par = jax.random.split(key, 3)

    # ragged batched graph -> dense zero-padded node features + node counts
    n_counts = jax.random.randint(k_cnt, (B,), 5, N + 1)
    h_nodes = jax.random.normal(k_feat, (B, N, IN_DIM), jnp.float32)
    node_mask = (jnp.arange(N)[None, :] < n_counts[:, None]).astype(jnp.float32)
    h_nodes = h_nodes * node_mask[:, :, None]
    n_nodes = n_counts.astype(jnp.float32)[:, None]     # [B, 1]

    params = init_params(k_par)
    ref = jax.block_until_ready(reference_forward(h_nodes, n_nodes, params))

    # Single-step grid (G == B).
    out = jax.block_until_ready(linear_gnn_layer(h_nodes, n_nodes, params))
    assert out.shape == (B, 1)
    np.testing.assert_allclose(np.asarray(out), np.asarray(ref),
                               rtol=1e-4, atol=1e-5)

    # Multi-step grid (G = 8, 3 steps) exercising the pipelined block path.
    out2 = jax.block_until_ready(
        linear_gnn_layer(h_nodes, n_nodes, params, graphs_per_step=8))
    np.testing.assert_allclose(np.asarray(out2), np.asarray(ref),
                               rtol=1e-4, atol=1e-5)

    print("KERNEL_OK")
</pallas_src>

<mosaic_0001>
module attributes {stable_mosaic.version = 11 : i64} {
  func.func @linear_gnn_kernel(%arg0: i32, %arg1: memref<24x144xf32, #tpu.memory_space<vmem>>, %arg2: memref<24x1xf32, #tpu.memory_space<vmem>>, %arg3: memref<144x50xf32, #tpu.memory_space<vmem>>, %arg4: memref<1x50xf32, #tpu.memory_space<vmem>>, %arg5: memref<50x50xf32, #tpu.memory_space<vmem>>, %arg6: memref<1x50xf32, #tpu.memory_space<vmem>>, %arg7: memref<50x1xf32, #tpu.memory_space<vmem>>, %arg8: memref<1x1xf32, #tpu.memory_space<vmem>>, %arg9: memref<24x1xf32, #tpu.memory_space<vmem>>) attributes {dimension_semantics = [#tpu.dimension_semantics<parallel>], iteration_bounds = array<i64: 1>, scalar_prefetch = 0 : i64, scratch_operands = 0 : i64, tpu.core_type = #tpu.core_type<tc>, window_params = [{transform_indices = @transform_0, window_bounds = array<i64: 24, 144>}, {transform_indices = @transform_1, window_bounds = array<i64: 24, 1>}, {pipeline_mode = #tpu.pipeline_mode<synchronous>, transform_indices = @transform_2, window_bounds = array<i64: 144, 50>}, {pipeline_mode = #tpu.pipeline_mode<synchronous>, transform_indices = @transform_3, window_bounds = array<i64: 1, 50>}, {pipeline_mode = #tpu.pipeline_mode<synchronous>, transform_indices = @transform_4, window_bounds = array<i64: 50, 50>}, {pipeline_mode = #tpu.pipeline_mode<synchronous>, transform_indices = @transform_5, window_bounds = array<i64: 1, 50>}, {pipeline_mode = #tpu.pipeline_mode<synchronous>, transform_indices = @transform_6, window_bounds = array<i64: 50, 1>}, {pipeline_mode = #tpu.pipeline_mode<synchronous>, transform_indices = @transform_7, window_bounds = array<i64: 1, 1>}, {transform_indices = @transform_8, window_bounds = array<i64: 24, 1>}]} {
    %c0 = arith.constant 0 : index
    %c0_0 = arith.constant 0 : index
    %0 = vector.load %arg1[%c0, %c0_0] : memref<24x144xf32, #tpu.memory_space<vmem>>, vector<24x144xf32>
    %c0_1 = arith.constant 0 : index
    %c0_2 = arith.constant 0 : index
    %1 = vector.load %arg3[%c0_1, %c0_2] : memref<144x50xf32, #tpu.memory_space<vmem>>, vector<144x50xf32>
    %cst = arith.constant dense<0.000000e+00> : vector<24x50xf32>
    %2 = tpu.matmul %0, %1, %cst {dimension_numbers = #tpu.dot_dimension_numbers<[1], [0], [0], [1], [0, 0, 1, 1], [], []>} : vector<24x144xf32>, vector<144x50xf32>, vector<24x50xf32> -> vector<24x50xf32>
    %c0_3 = arith.constant 0 : index
    %c0_4 = arith.constant 0 : index
    %3 = vector.load %arg2[%c0_3, %c0_4] : memref<24x1xf32, #tpu.memory_space<vmem>>, vector<24x1xf32>
    %4 = vector.broadcast %3 : vector<24x1xf32> to vector<24x50xf32>
    %5 = arith.mulf %2, %4 : vector<24x50xf32>
    %c0_5 = arith.constant 0 : index
    %c0_6 = arith.constant 0 : index
    %6 = vector.load %arg4[%c0_5, %c0_6] : memref<1x50xf32, #tpu.memory_space<vmem>>, vector<1x50xf32>
    %7 = vector.broadcast %6 : vector<1x50xf32> to vector<24x50xf32>
    %8 = arith.addf %5, %7 : vector<24x50xf32>
    %cst_7 = arith.constant 0.000000e+00 : f32
    %9 = vector.broadcast %cst_7 : f32 to vector<24x50xf32>
    %10 = arith.cmpf ogt, %8, %9 : vector<24x50xf32>
    %cst_8 = arith.constant 0.00999999977 : f32
    %11 = vector.broadcast %cst_8 : f32 to vector<24x50xf32>
    %12 = arith.mulf %11, %8 : vector<24x50xf32>
    %13 = arith.select %10, %8, %12 : vector<24x50xi1>, vector<24x50xf32>
    %c0_9 = arith.constant 0 : index
    %c0_10 = arith.constant 0 : index
    %14 = vector.load %arg5[%c0_9, %c0_10] : memref<50x50xf32, #tpu.memory_space<vmem>>, vector<50x50xf32>
    %cst_11 = arith.constant dense<0.000000e+00> : vector<24x50xf32>
    %15 = tpu.matmul %13, %14, %cst_11 {dimension_numbers = #tpu.dot_dimension_numbers<[1], [0], [0], [1], [0, 0, 1, 1], [], []>} : vector<24x50xf32>, vector<50x50xf32>, vector<24x50xf32> -> vector<24x50xf32>
    %c0_12 = arith.constant 0 : index
    %c0_13 = arith.constant 0 : index
    %16 = vector.load %arg6[%c0_12, %c0_13] : memref<1x50xf32, #tpu.memory_space<vmem>>, vector<1x50xf32>
    %17 = vector.broadcast %16 : vector<1x50xf32> to vector<24x50xf32>
    %18 = arith.addf %15, %17 : vector<24x50xf32>
    %cst_14 = arith.constant 0.000000e+00 : f32
    %19 = vector.broadcast %cst_14 : f32 to vector<24x50xf32>
    %20 = arith.cmpf ogt, %18, %19 : vector<24x50xf32>
    %cst_15 = arith.constant 0.00999999977 : f32
    %21 = vector.broadcast %cst_15 : f32 to vector<24x50xf32>
    %22 = arith.mulf %21, %18 : vector<24x50xf32>
    %23 = arith.select %20, %18, %22 : vector<24x50xi1>, vector<24x50xf32>
    %c0_16 = arith.constant 0 : index
    %c0_17 = arith.constant 0 : index
    %24 = vector.load %arg7[%c0_16, %c0_17] : memref<50x1xf32, #tpu.memory_space<vmem>>, vector<50x1xf32>
    %cst_18 = arith.constant dense<0.000000e+00> : vector<24x1xf32>
    %25 = tpu.matmul %23, %24, %cst_18 {dimension_numbers = #tpu.dot_dimension_numbers<[1], [0], [0], [1], [0, 0, 1, 1], [], []>} : vector<24x50xf32>, vector<50x1xf32>, vector<24x1xf32> -> vector<24x1xf32>
    %c0_19 = arith.constant 0 : index
    %c0_20 = arith.constant 0 : index
    %26 = vector.load %arg8[%c0_19, %c0_20] : memref<1x1xf32, #tpu.memory_space<vmem>>, vector<1x1xf32>
    %27 = vector.broadcast %26 : vector<1x1xf32> to vector<24x1xf32>
    %28 = arith.addf %25, %27 : vector<24x1xf32>
    %cst_21 = arith.constant 0.000000e+00 : f32
    %29 = vector.broadcast %cst_21 : f32 to vector<24x1xf32>
    %30 = arith.cmpf ogt, %28, %29 : vector<24x1xf32>
    %cst_22 = arith.constant 0.00999999977 : f32
    %31 = vector.broadcast %cst_22 : f32 to vector<24x1xf32>
    %32 = arith.mulf %31, %28 : vector<24x1xf32>
    %33 = arith.select %30, %28, %32 : vector<24x1xi1>, vector<24x1xf32>
    %c0_23 = arith.constant 0 : index
    %c0_24 = arith.constant 0 : index
    %34 = vector.load %arg9[%c0_23, %c0_24] : memref<24x1xf32, #tpu.memory_space<vmem>>, vector<24x1xf32>
    tpu.vector_store %arg9[%c0_23, %c0_24], %33 {strides = array<i32>} : memref<24x1xf32, #tpu.memory_space<vmem>>, vector<24x1xf32>,
    return
  }
  func.func @transform_0(%arg0: i32) -> (i32, i32) {
    %c0_i32 = arith.constant 0 : i32
    %c0_i32_0 = arith.constant 0 : i32
    return %arg0, %c0_i32 : i32, i32
  }
  func.func @transform_1(%arg0: i32) -> (i32, i32) {
    %c0_i32 = arith.constant 0 : i32
    %c0_i32_0 = arith.constant 0 : i32
    return %arg0, %c0_i32 : i32, i32
  }
  func.func @transform_2(%arg0: i32) -> (i32, i32) {
    %c0_i32 = arith.constant 0 : i32
    %c0_i32_0 = arith.constant 0 : i32
    %c0_i32_1 = arith.constant 0 : i32
    return %c0_i32, %c0_i32_0 : i32, i32
  }
  func.func @transform_3(%arg0: i32) -> (i32, i32) {
    %c0_i32 = arith.constant 0 : i32
    %c0_i32_0 = arith.constant 0 : i32
    %c0_i32_1 = arith.constant 0 : i32
    return %c0_i32, %c0_i32_0 : i32, i32
  }
  func.func @transform_4(%arg0: i32) -> (i32, i32) {
    %c0_i32 = arith.constant 0 : i32
    %c0_i32_0 = arith.constant 0 : i32
    %c0_i32_1 = arith.constant 0 : i32
    return %c0_i32, %c0_i32_0 : i32, i32
  }
  func.func @transform_5(%arg0: i32) -> (i32, i32) {
    %c0_i32 = arith.constant 0 : i32
    %c0_i32_0 = arith.constant 0 : i32
    %c0_i32_1 = arith.constant 0 : i32
    return %c0_i32, %c0_i32_0 : i32, i32
  }
  func.func @transform_6(%arg0: i32) -> (i32, i32) {
    %c0_i32 = arith.constant 0 : i32
    %c0_i32_0 = arith.constant 0 : i32
    %c0_i32_1 = arith.constant 0 : i32
    return %c0_i32, %c0_i32_0 : i32, i32
  }
  func.func @transform_7(%arg0: i32) -> (i32, i32) {
    %c0_i32 = arith.constant 0 : i32
    %c0_i32_0 = arith.constant 0 : i32
    %c0_i32_1 = arith.constant 0 : i32
    return %c0_i32, %c0_i32_0 : i32, i32
  }
  func.func @transform_8(%arg0: i32) -> (i32, i32) {
    %c0_i32 = arith.constant 0 : i32
    %c0_i32_0 = arith.constant 0 : i32
    return %arg0, %c0_i32 : i32, i32
  }
}

</mosaic_0001>

<bundles_post_ra>
// kernel: tpu_custom_call.1
= control target key start
LH: loop header
LB: loop body
LE: loop exit
PB: predicated region body
PF: predicated region fallthrough
CT: control target
= control target key end

     0   :  { %v297_v2 = vmov 0   ;;  %vm55_vm0 = vcmask 130048   ;;  %vm175_vm1 = vcmask 1041408   ;;  %vm165_vm3 = vcmask 408576   ;;  %s495_s2 = inlined_call_operand.vmem [shape: f32[144,50], index: 2, kind: input, shape index: {}]   ;;  %s496_s0 = inlined_call_operand.vmem [shape: f32[24,144], index: 0, kind: input, shape index: {}]   ;;  %s497_s1 = inlined_call_operand.vmem [shape: f32[24,1], index: 1, kind: input, shape index: {}]   ;;  %s498_s3 = inlined_call_operand.vmem [shape: f32[1,50], index: 3, kind: input, shape index: {}]   ;;  %s499_s5 = inlined_call_operand.vmem [shape: f32[1,50], index: 5, kind: input, shape index: {}]   ;;  %s500_s4 = inlined_call_operand.vmem [shape: f32[50,50], index: 4, kind: input, shape index: {}]   ;;  %s501_s6 = inlined_call_operand.vmem [shape: f32[50,1], index: 6, kind: input, shape index: {}]   ;;  %s502_s7 = inlined_call_operand.<no memory space> [shape: f32[1,1], index: 7, kind: input, shape index: {}]   ;;  %s503_s8 = inlined_call_operand.vmem [shape: f32[24,1], index: 8, kind: output, shape index: {}]  }
   0x1   :  { %v52_v0 = vld [vmem:[%s495_s2 + $0x78] sm:$0xff]  ;;  %v51_v1 = vld [vmem:[%s495_s2 + $0x70] sm:$0xff]  ;;  %292 = vset.pattern.permute.xlu0 %v297_v2  ;;  %v50_v3 = vld [vmem:[%s495_s2 + $0x68] sm:$0xff]  ;;  %293 = vset.pattern.permute.xlu1 %v297_v2  ;;  %vm272_vm10 = vcmask 7168  }
   0x2   :  { %65 = vmatpush.msra.mxu0 %v52_v0  ;;  %v49_v4 = vld [vmem:[%s495_s2 + $0x60] sm:$0xff]  ;;  %v54_v5 = vld [vmem:[%s495_s2 + $0x88] sm:$0xff]  ;;  %v48_v7 = vld [vmem:[%s495_s2 + $0x58] sm:$0xff] }
   0x3   :  { %v53_v6 = vld [vmem:[%s495_s2 + $0x80] sm:$0xff]  ;;  %105 = vmatpush.msra.mxu1 %v54_v5  ;;  %v32_v8 = vld [vmem:[%s496_s0 + $0x8] sm:$0xff]  ;;  %v47_v10 = vld [vmem:[%s495_s2 + $0x50] sm:$0xff] }
   0x4   :  { %66 = vmatpush.msra.mxu0 %v51_v1  ;;  %v117_v9 = vld [vmem:[%s497_s1] sm:$0xff]  ;;  %v46_v11 = vld [vmem:[%s495_s2 + $0x48] sm:$0xff]  ;;  %v44_v14 = vld [vmem:[%s495_s2 + $0x38] sm:$0xff] }
   0x5   :  { %122 = vperm.xlu0 %292, %v117_v9   ;;  %106 = vmatpush.msra.mxu1 %v53_v6  ;;  %v45_v12 = vld [vmem:[%s495_s2 + $0x40] sm:$0xff]  ;;  %v118_v13 = vld [vmem:[%s497_s1 + $0x8] sm:$0xff]  ;;  %v34_v15 = vld [vmem:[%s496_s0 + $0x18] sm:$0xff] }
   0x6   :  { %67 = vmatpush.msra.mxu0 %v50_v3  ;;  %280 = vmatmul.msk.f32.vlgmr.msra.gmra.mxu1 %vm55_vm0, %v32_v8  ;;  %v43_v16 = vld [vmem:[%s495_s2 + $0x30] sm:$0xff]  ;;  %v42_v18 = vld [vmem:[%s495_s2 + $0x28] sm:$0xff]  ;;  %v41_v19 = vld [vmem:[%s495_s2 + $0x20] sm:$0xff]  ;;  %v13_v3 = vstv %s502_s7 }
   0x7   :  { %v119_v17 = vld [vmem:[%s497_s1 + $0x10] sm:$0xff]  ;;  %v40_v20 = vld [vmem:[%s495_s2 + $0x18] sm:$0xff]  ;;  %v36_v21 = vld [vmem:[%s496_s0 + $0x28] sm:$0xff]  ;;  %14 = vst [vmem:[#allocation2] sm:$0x1] %v13_v3 }
   0x8   :  { %68 = vmatpush.msra.mxu0 %v49_v4  ;;  %132 = vperm.xlu1 %293, %v119_v17   ;;  %v39_v22 = vld [vmem:[%s495_s2 + $0x10] sm:$0xff]  ;;  %v38_v23 = vld [vmem:[%s495_s2 + $0x8] sm:$0xff]  ;;  %v37_v24 = vld [vmem:[%s495_s2] sm:$0xff] }
   0x9   :  { %v31_v25 = vld [vmem:[%s496_s0] sm:$0xff]  ;;  %v33_v26 = vld [vmem:[%s496_s0 + $0x10] sm:$0xff]  ;;  %v159_v29 = vld [vmem:[%s500_s4 + $0x28] sm:$0xff] }
   0xa   :  { %69 = vmatpush.msra.mxu0 %v48_v7  ;;  %v35_v27 = vld [vmem:[%s496_s0 + $0x20] sm:$0xff]  ;;  %v160_v28 = vld [vmem:[%s500_s4 + $0x30] sm:$0x3]  ;;  %v157_v31 = vld [vmem:[%s500_s4 + $0x18] sm:$0xff] }
   0xb   :  { %283 = vmatpush.msk.msra.mxu2 %vm175_vm1, %v160_v28  ;;  %v158_v30 = vld [vmem:[%s500_s4 + $0x20] sm:$0xff]  ;;  %v156_v32 = vld [vmem:[%s500_s4 + $0x10] sm:$0xff]  ;;  %v155_v33 = vld [vmem:[%s500_s4 + $0x8] sm:$0xff] }
   0xc   :  { %70 = vmatpush.msra.mxu0 %v47_v10  ;;  %v154_v34 = vld [vmem:[%s500_s4] sm:$0xff]  ;;  %v220_v36 = vld [vmem:[%s501_s6 + $0x30] sm:$0x3]  ;;  %v219_v37 = vld [vmem:[%s501_s6 + $0x28] sm:$0xff] }
   0xd   :  { %127 = vperm.xlu0 %292, %v118_v13   ;;  %189 = vmatpush.msra.mxu2 %v159_v29  ;;  %v218_v38 = vld [vmem:[%s501_s6 + $0x20] sm:$0xff]  ;;  %v217_v39 = vld [vmem:[%s501_s6 + $0x18] sm:$0xff]  ;;  %v216_v0 = vld [vmem:[%s501_s6 + $0x10] sm:$0xff] }
   0xe   :  { %71 = vmatpush.msra.mxu0 %v46_v11  ;;  %281 = vmatmul.msk.f32.gmra.mxu1 %vm55_vm0, %v34_v15  ;;  %v294_v43 = vld [vmem:[%s498_s3] ss:$0 sm:$0xff]  ;;  %v215_v1 = vld [vmem:[%s501_s6 + $0x8] sm:$0xff] }
   0xf   :  { %190 = vmatpush.msra.mxu2 %v158_v30  ;;  %287 = vmatpush.msk.msra.mxu3 %vm175_vm1, %v220_v36  ;;  %v214_v2 = vld [vmem:[%s501_s6] sm:$0xff] }
  0x10   :  { %72 = vmatpush.msra.mxu0 %v45_v12  ;;  %v295_v4 = vld [vmem:[%s499_s5] ss:$0 sm:$0xff] }
  0x11   :  { %191 = vmatpush.msra.mxu2 %v157_v31  ;;  %247 = vmatpush.msra.mxu3 %v219_v37  ;;  %v296_v17 = vld [vmem:[#allocation2] ss:$0 sm:$0xff] }
  0x12   :  { %73 = vmatpush.msra.mxu0 %v44_v14 }
  0x13   :  { %192 = vmatpush.msra.mxu2 %v156_v32  ;;  %248 = vmatpush.msra.mxu3 %v218_v38 }
  0x14   :  { %74 = vmatpush.msra.mxu0 %v43_v16 }
  0x15   :  { %193 = vmatpush.msra.mxu2 %v155_v33  ;;  %249 = vmatpush.msra.mxu3 %v217_v39 }
  0x16   :  { %75 = vmatpush.msra.mxu0 %v42_v18  ;;  %282 = vmatmul.msk.f32.gmra.mxu1 %vm55_vm0, %v36_v21 }
  0x17   :  { %194 = vmatpush.msra.mxu2 %v154_v34  ;;  %250 = vmatpush.msra.mxu3 %v216_v0 }
  0x18   :  { %76 = vmatpush.msra.mxu0 %v41_v19 }
  0x19   :  { %251 = vmatpush.msra.mxu3 %v215_v1 }
  0x1a   :  { %77 = vmatpush.msra.mxu0 %v40_v20 }
  0x1b   :  { %252 = vmatpush.msra.mxu3 %v214_v2 }
  0x1c   :  { %78 = vmatpush.msra.mxu0 %v39_v22 }
  0x1e   :  { %79 = vmatpush.msra.mxu0 %v38_v23 }
  0x20   :  { %80 = vmatpush.msra.mxu0 %v37_v24 }
  0x21   :  { %81 = vmatmul.f32.vlgmr.msra.gmra.mxu0 %v31_v25 }
  0x29   :  { %84 = vmatmul.f32.gmra.mxu0 %v33_v26 }
  0x31   :  { %87 = vmatmul.f32.gmra.mxu0 %v35_v27 }
  0x77   :  { %v123_v40 = vpop.permute.xlu0 %122 }
  0x7a   :  { %v133_v57 = vpop.permute.xlu1 %132 }
  0x7f   :  { %v128_v51 = vpop.permute.xlu0 %127 }
  0x83   :  { %v108_v35 = vpop.f32.mrf.mxu1 }
  0x8b   :  { %v111_v45 = vpop.f32.mrf.mxu1 }
  0x93   :  { %v114_v54 = vpop.f32.mrf.mxu1 }
  0x9e   :  { %v82_v41 = vpop.f32.mrf.mxu0 }
  0x9f   :  { %v109_v42 = vadd.f32 %v108_v35, %v82_v41 }
  0xa1   :  { %v135_v44 = vmul.f32 %v123_v40, %v109_v42 }
  0xa3   :  { %v142_v46 = vadd.f32 %v294_v43, %v135_v44 }
  0xa5   :  { %vm145_vm2 = vcmp.gt.f32.partialorder %v142_v46, 0.0  ;;  %v148_v47 = vmul.f32 0.01, %v142_v46 }
  0xa6   :  { %v85_v48 = vpop.f32.mrf.mxu0 }
  0xa7   :  { %v112_v49 = vadd.f32 %v111_v45, %v85_v48  ;;  %v151_v50 = vsel %vm145_vm2, %v142_v46, %v148_v47 }
  0xa8   :  { %284 = vmatmul.msk.f32.vlgmr.msra.gmra.mxu2 %vm165_vm3, %v151_v50 }
  0xa9   :  { %v136_v52 = vmul.f32 %v128_v51, %v112_v49 }
  0xab   :  { %v143_v53 = vadd.f32 %v294_v43, %v136_v52 }
  0xad   :  { %vm146_vm4 = vcmp.gt.f32.partialorder %v143_v53, 0.0  ;;  %v149_v55 = vmul.f32 0.01, %v143_v53 }
  0xae   :  { %v88_v56 = vpop.f32.mrf.mxu0 }
  0xaf   :  { %v115_v58 = vadd.f32 %v114_v54, %v88_v56  ;;  %v152_v59 = vsel %vm146_vm4, %v143_v53, %v149_v55 }
  0xb0   :  { %285 = vmatmul.msk.f32.gmra.mxu2 %vm165_vm3, %v152_v59 }
  0xb1   :  { %v137_v60 = vmul.f32 %v133_v57, %v115_v58 }
  0xb3   :  { %v144_v61 = vadd.f32 %v294_v43, %v137_v60 }
  0xb5   :  { %vm147_vm5 = vcmp.gt.f32.partialorder %v144_v61, 0.0  ;;  %v150_v62 = vmul.f32 0.01, %v144_v61 }
  0xb7   :  { %v153_v63 = vsel %vm147_vm5, %v144_v61, %v150_v62 }
  0xb8   :  { %286 = vmatmul.msk.f32.gmra.mxu2 %vm165_vm3, %v153_v63 }
 0x12b   :  { %v196_v5 = vpop.f32.mrf.mxu2 }
 0x12c   :  { %v197_v6 = vadd.f32 %v295_v4, %v196_v5 }
 0x12e   :  { %v208_v7 = vmul.f32 0.01, %v197_v6  ;;  %vm205_vm6 = vcmp.gt.f32.partialorder %v197_v6, 0.0 }
 0x130   :  { %v211_v8 = vsel %vm205_vm6, %v197_v6, %v208_v7 }
 0x131   :  { %288 = vmatmul.msk.f32.vlgmr.msra.gmra.mxu3 %vm165_vm3, %v211_v8 }
 0x133   :  { %v199_v9 = vpop.f32.mrf.mxu2 }
 0x134   :  { %v200_v10 = vadd.f32 %v295_v4, %v199_v9 }
 0x136   :  { %v209_v11 = vmul.f32 0.01, %v200_v10  ;;  %vm206_vm7 = vcmp.gt.f32.partialorder %v200_v10, 0.0 }
 0x138   :  { %v212_v12 = vsel %vm206_vm7, %v200_v10, %v209_v11 }
 0x139   :  { %289 = vmatmul.msk.f32.gmra.mxu3 %vm165_vm3, %v212_v12 }
 0x13b   :  { %v202_v13 = vpop.f32.mrf.mxu2 }
 0x13c   :  { %v203_v14 = vadd.f32 %v295_v4, %v202_v13 }
 0x13e   :  { %v210_v15 = vmul.f32 0.01, %v203_v14  ;;  %vm207_vm8 = vcmp.gt.f32.partialorder %v203_v14, 0.0 }
 0x140   :  { %v213_v16 = vsel %vm207_vm8, %v203_v14, %v210_v15 }
 0x141   :  { %290 = vmatmul.msk.f32.gmra.mxu3 %vm165_vm3, %v213_v16 }
 0x1b4   :  { %v254_v18 = vpop.f32.mrf.mxu3 }
 0x1b5   :  { %v255_v19 = vadd.f32 %v296_v17, %v254_v18 }
 0x1b7   :  { %vm263_vm9 = vcmp.gt.f32.partialorder %v255_v19, 0.0  ;;  %v266_v20 = vmul.f32 0.01, %v255_v19 }
 0x1b9   :  { %v269_v21 = vsel %vm263_vm9, %v255_v19, %v266_v20 }
 0x1ba   :  { %273 = vst.msk [vmem:[%s503_s8] sm:$0xff] %vm272_vm10, %v269_v21 }
 0x1bc   :  { %v257_v22 = vpop.f32.mrf.mxu3 }
 0x1bd   :  { %v258_v23 = vadd.f32 %v296_v17, %v257_v22 }
 0x1bf   :  { %vm264_vm11 = vcmp.gt.f32.partialorder %v258_v23, 0.0  ;;  %v267_v24 = vmul.f32 0.01, %v258_v23 }
 0x1c1   :  { %v270_v25 = vsel %vm264_vm11, %v258_v23, %v267_v24 }
 0x1c2   :  { %274 = vst.msk [vmem:[%s503_s8 + $0x8] sm:$0xff] %vm272_vm10, %v270_v25 }
 0x1c4   :  { %v260_v26 = vpop.f32.mrf.mxu3 }
 0x1c5   :  { %v261_v27 = vadd.f32 %v296_v17, %v260_v26 }
 0x1c7   :  { %vm265_vm12 = vcmp.gt.f32.partialorder %v261_v27, 0.0  ;;  %v268_v28 = vmul.f32 0.01, %v261_v27 }
 0x1c9   :  { %v271_v29 = vsel %vm265_vm12, %v261_v27, %v268_v28 }
 0x1ca   :  { %275 = vst.msk [vmem:[%s503_s8 + $0x10] sm:$0xff] %vm272_vm10, %v271_v29 }

</bundles_post_ra>
